<compile_context>
chip_gen: v6e
topology: v6e:2x2x1
jax: 0.10.0
libtpu: 0.0.40
codegen_flags: <defaults>
</compile_context>

<pallas_src>
import jax
import jax.numpy as jnp
from jax.experimental import pallas as pl
from jax.experimental.pallas import tpu as pltpu  # noqa: F401

# ---------------- sizes (small, consistent with the module's forward) ----------------
B = 2            # batch
N = 64           # input points per cloud
F = 64           # latent feature dims
H1, H2 = 32, 64  # encoder hidden widths
HD = 32          # decoder (folding) hidden width
GRID_SIDE = 4
M = GRID_SIDE * GRID_SIDE   # decoded points per cloud

LANES = 128


def _pad8(n):
    return ((n + 7) // 8) * 8


# ---------------- packed parameter slab layout (static row offsets) ----------------
# rows 0..7 hold one bias per sublane row; weights follow, each 8-row padded,
# all lane-padded to 128.
_ROW_BIAS  = 0                              # b1,b2,b3,f2b,bfused,g2b,g3b in rows 0..6
_ROW_W1    = 8                              # (3,  H1)
_ROW_W2    = _ROW_W1 + _pad8(3)             # (H1, H2)
_ROW_W3    = _ROW_W2 + _pad8(H1)            # (H2, F)
_ROW_WFEAT = _ROW_W3 + _pad8(H2)            # (F,  2*HD)  concat([f1wf, g1wf], axis=1)
_ROW_F2W   = _ROW_WFEAT + _pad8(F)          # (HD, HD)
_ROW_WFUSE = _ROW_F2W + _pad8(HD)           # (HD, HD)    f3w @ g1wp
_ROW_G2W   = _ROW_WFUSE + _pad8(HD)         # (HD, HD)
_ROW_G3W   = _ROW_G2W + _pad8(HD)           # (HD, 3)
_ROW_GRIDB = _ROW_G3W + _pad8(HD)           # (M,  HD)    grid @ f1wg + f1b
_SLAB_ROWS = _ROW_GRIDB + _pad8(M)          # 320


def recon_kernel(x_ref, p_ref, out_ref, feat_ref):
    f32 = jnp.float32

    # --- carve static views out of the packed parameter slab ---
    w1    = p_ref[_ROW_W1:_ROW_W1 + 3, :H1]
    w2    = p_ref[_ROW_W2:_ROW_W2 + H1, :H2]
    w3    = p_ref[_ROW_W3:_ROW_W3 + H2, :F]
    wfeat = p_ref[_ROW_WFEAT:_ROW_WFEAT + F, :2 * HD]
    f2w   = p_ref[_ROW_F2W:_ROW_F2W + HD, :HD]
    wfuse = p_ref[_ROW_WFUSE:_ROW_WFUSE + HD, :HD]
    g2w   = p_ref[_ROW_G2W:_ROW_G2W + HD, :HD]
    g3w   = p_ref[_ROW_G3W:_ROW_G3W + HD, :3]
    gridb = p_ref[_ROW_GRIDB:_ROW_GRIDB + M, :HD]

    b1    = p_ref[_ROW_BIAS + 0:_ROW_BIAS + 1, :H1]
    b2    = p_ref[_ROW_BIAS + 1:_ROW_BIAS + 2, :H2]
    b3    = p_ref[_ROW_BIAS + 2:_ROW_BIAS + 3, :F]
    f2b   = p_ref[_ROW_BIAS + 3:_ROW_BIAS + 4, :HD]
    bfuse = p_ref[_ROW_BIAS + 4:_ROW_BIAS + 5, :HD]
    g2b   = p_ref[_ROW_BIAS + 5:_ROW_BIAS + 6, :HD]
    g3b   = p_ref[_ROW_BIAS + 6:_ROW_BIAS + 7, :3]

    # ---------------- encoder: shared pointwise MLP over all B*N points ----------------
    x = x_ref[...]                                                          # (B*N, 3)
    h = jnp.maximum(jnp.dot(x, w1, preferred_element_type=f32) + b1, 0.0)
    h = jnp.maximum(jnp.dot(h, w2, preferred_element_type=f32) + b2, 0.0)
    h = jnp.dot(h, w3, preferred_element_type=f32) + b3                     # (B*N, F)

    # per-cloud global max pool (one cross-sublane reduce)
    feat = h.reshape(B, N, F).max(axis=1)                                   # (B, F)
    feat_ref[...] = feat

    # ---------------- decoder: two folding MLPs over the 2D grid ----------------
    # both fold-layer-1 feature projections in one matmul, lane-sliced after
    fp = jnp.dot(feat, wfeat, preferred_element_type=f32)                   # (B, 2*HD)
    fp1 = fp[:, :HD]                                                        # fold-1 term
    fp2 = fp[:, HD:]                                                        # fold-2 term

    # fold 1, layer 1: relu(feat @ f1wf + (grid @ f1wg + f1b))  (grid term in gridb)
    h1 = jnp.maximum(fp1[:, None, :] + gridb[None, :, :], 0.0)              # (B, M, HD)
    h1 = h1.reshape(B * M, HD)
    # fold 1, layer 2
    h1 = jnp.maximum(jnp.dot(h1, f2w, preferred_element_type=f32) + f2b, 0.0)

    # fold 2, layer 1:  relu(feat @ g1wf + p1 @ g1wp + g1b)
    #   with p1 = h1 @ f3w + f3b eliminated:  p1 @ g1wp + g1b == h1 @ wfuse + bfuse
    fp2_rep = jnp.broadcast_to(fp2[:, None, :], (B, M, HD)).reshape(B * M, HD)
    h2 = jnp.maximum(fp2_rep + jnp.dot(h1, wfuse, preferred_element_type=f32) + bfuse, 0.0)
    # fold 2, layers 2..3
    h2 = jnp.maximum(jnp.dot(h2, g2w, preferred_element_type=f32) + g2b, 0.0)
    out_ref[...] = jnp.dot(h2, g3w, preferred_element_type=f32) + g3b       # (B*M, 3)


def prepare_params(params, grid_pts):
    """One-time parameter preprocessing + packing into a single (320,128) slab."""
    (w1, b1, w2, b2, w3, b3,
     f1wf, f1wg, f1b, f2w, f2b, f3w, f3b,
     g1wf, g1wp, g1b, g2w, g2b, g3w, g3b) = params

    # constant folding-grid term of fold-1 layer 1
    gridb = jnp.dot(grid_pts, f1wg) + f1b                                   # (M, HD)
    # algebraic elimination of p1:  p1 @ g1wp + g1b == h1 @ wfuse + bfuse
    wfuse = jnp.dot(f3w, g1wp)                                              # (HD, HD)
    bfuse = jnp.dot(f3b, g1wp) + g1b                                        # (1, HD)
    # fused per-cloud feature projections
    wfeat = jnp.concatenate([f1wf, g1wf], axis=1)                           # (F, 2*HD)

    slab = jnp.zeros((_SLAB_ROWS, LANES), jnp.float32)

    def put(s, row, arr):
        return s.at[row:row + arr.shape[0], :arr.shape[1]].set(arr)

    slab = put(slab, _ROW_BIAS + 0, b1)
    slab = put(slab, _ROW_BIAS + 1, b2)
    slab = put(slab, _ROW_BIAS + 2, b3)
    slab = put(slab, _ROW_BIAS + 3, f2b)
    slab = put(slab, _ROW_BIAS + 4, bfuse)
    slab = put(slab, _ROW_BIAS + 5, g2b)
    slab = put(slab, _ROW_BIAS + 6, g3b)
    slab = put(slab, _ROW_W1, w1)
    slab = put(slab, _ROW_W2, w2)
    slab = put(slab, _ROW_W3, w3)
    slab = put(slab, _ROW_WFEAT, wfeat)
    slab = put(slab, _ROW_F2W, f2w)
    slab = put(slab, _ROW_WFUSE, wfuse)
    slab = put(slab, _ROW_G2W, g2w)
    slab = put(slab, _ROW_G3W, g3w)
    slab = put(slab, _ROW_GRIDB, gridb)
    return slab


@jax.jit
def reconstruction_net(x, slab):
    """x: (B, N, 3) float32, slab: packed params -> (output (B, M, 3), feature (B, F))."""
    x_flat = x.reshape(B * N, 3)

    flops = 2 * (B * N * (3 * H1 + H1 * H2 + H2 * F)     # encoder MLP
                 + B * F * 2 * HD                        # fused feature projections
                 + B * M * (3 * HD * HD + 3 * HD))       # folding MLPs
    bytes_accessed = 4 * (B * N * 3 + _SLAB_ROWS * LANES + B * M * 3 + B * F)

    out_flat, feat = pl.pallas_call(
        recon_kernel,
        out_shape=(
            jax.ShapeDtypeStruct((B * M, 3), jnp.float32),
            jax.ShapeDtypeStruct((B, F), jnp.float32),
        ),
        in_specs=[
            pl.BlockSpec((B * N, 3), lambda: (0, 0)),
            pl.BlockSpec((_SLAB_ROWS, LANES), lambda: (0, 0)),
        ],
        out_specs=(
            pl.BlockSpec((B * M, 3), lambda: (0, 0)),   # reconstructed points (flat)
            pl.BlockSpec((B, F), lambda: (0, 0)),       # latent features
        ),
        cost_estimate=pl.CostEstimate(flops=flops, transcendentals=0,
                                      bytes_accessed=bytes_accessed),
    )(x_flat, slab)

    return out_flat.reshape(B, M, 3), feat


def init_params(key):
    """Deterministic synthetic parameters (biases stored as (1, C) rows)."""
    keys = jax.random.split(key, 14)

    def w(k, shape, fan_in):
        return jax.random.normal(k, shape, jnp.float32) / jnp.sqrt(jnp.float32(fan_in))

    # encoder: 3 -> H1 -> H2 -> F
    w1 = w(keys[0], (3, H1), 3);    b1 = jnp.zeros((1, H1), jnp.float32)
    w2 = w(keys[1], (H1, H2), H1);  b2 = jnp.zeros((1, H2), jnp.float32)
    w3 = w(keys[2], (H2, F), H2);   b3 = jnp.zeros((1, F), jnp.float32)

    # fold 1: (F + 2) -> HD -> HD -> 3   (first layer split into feat / grid parts)
    f1wf = w(keys[3], (F, HD), F + 2)
    f1wg = w(keys[4], (2, HD), F + 2);  f1b = jnp.zeros((1, HD), jnp.float32)
    f2w = w(keys[5], (HD, HD), HD);     f2b = jnp.zeros((1, HD), jnp.float32)
    f3w = w(keys[6], (HD, 3), HD);      f3b = jnp.zeros((1, 3), jnp.float32)

    # fold 2: (F + 3) -> HD -> HD -> 3   (first layer split into feat / point parts)
    g1wf = w(keys[7], (F, HD), F + 3)
    g1wp = w(keys[8], (3, HD), F + 3);  g1b = jnp.zeros((1, HD), jnp.float32)
    g2w = w(keys[9], (HD, HD), HD);     g2b = jnp.zeros((1, HD), jnp.float32)
    g3w = w(keys[10], (HD, 3), HD);     g3b = jnp.zeros((1, 3), jnp.float32)

    return (w1, b1, w2, b2, w3, b3,
            f1wf, f1wg, f1b, f2w, f2b, f3w, f3b,
            g1wf, g1wp, g1b, g2w, g2b, g3w, g3b)


def make_folding_grid():
    lin = jnp.linspace(-1.0, 1.0, GRID_SIDE, dtype=jnp.float32)
    gx, gy = jnp.meshgrid(lin, lin, indexing="ij")
    return jnp.stack([gx.reshape(-1), gy.reshape(-1)], axis=-1)   # (M, 2)


if __name__ == "__main__":
    key = jax.random.PRNGKey(0)
    k_x, k_p = jax.random.split(key)

    # input point cloud, (B, N, 3)  == PyTorch (B, 3, N) transposed
    x = jax.random.normal(k_x, (B, N, 3), jnp.float32)
    params = init_params(k_p)
    grid_pts = make_folding_grid()

    # one-time constant preprocessing + slab packing (outside the jitted forward)
    slab = jax.block_until_ready(prepare_params(params, grid_pts))

    output, feature = reconstruction_net(x, slab)
    jax.block_until_ready((output, feature))

    assert output.shape == (B, M, 3)
    assert feature.shape == (B, F)
    print("KERNEL_OK")
</pallas_src>

<mosaic_0001>
module attributes {stable_mosaic.version = 11 : i64} {
  func.func @recon_kernel(%arg0: memref<128x3xf32, #tpu.memory_space<vmem>>, %arg1: memref<320x128xf32, #tpu.memory_space<vmem>>, %arg2: memref<32x3xf32, #tpu.memory_space<vmem>>, %arg3: memref<2x64xf32, #tpu.memory_space<vmem>>) attributes {dimension_semantics = [], scalar_prefetch = 0 : i64, scratch_operands = 0 : i64, tpu.core_type = #tpu.core_type<tc>} {
    %c8 = arith.constant 8 : index
    %c0 = arith.constant 0 : index
    %0 = vector.load %arg1[%c8, %c0] : memref<320x128xf32, #tpu.memory_space<vmem>>, vector<3x32xf32>
    %c16 = arith.constant 16 : index
    %c0_0 = arith.constant 0 : index
    %1 = vector.load %arg1[%c16, %c0_0] : memref<320x128xf32, #tpu.memory_space<vmem>>, vector<32x64xf32>
    %c48 = arith.constant 48 : index
    %c0_1 = arith.constant 0 : index
    %2 = vector.load %arg1[%c48, %c0_1] : memref<320x128xf32, #tpu.memory_space<vmem>>, vector<64x64xf32>
    %c112 = arith.constant 112 : index
    %c0_2 = arith.constant 0 : index
    %3 = vector.load %arg1[%c112, %c0_2] : memref<320x128xf32, #tpu.memory_space<vmem>>, vector<64x64xf32>
    %c176 = arith.constant 176 : index
    %c0_3 = arith.constant 0 : index
    %4 = vector.load %arg1[%c176, %c0_3] : memref<320x128xf32, #tpu.memory_space<vmem>>, vector<32x32xf32>
    %c208 = arith.constant 208 : index
    %c0_4 = arith.constant 0 : index
    %5 = vector.load %arg1[%c208, %c0_4] : memref<320x128xf32, #tpu.memory_space<vmem>>, vector<32x32xf32>
    %c240 = arith.constant 240 : index
    %c0_5 = arith.constant 0 : index
    %6 = vector.load %arg1[%c240, %c0_5] : memref<320x128xf32, #tpu.memory_space<vmem>>, vector<32x32xf32>
    %c272 = arith.constant 272 : index
    %c0_6 = arith.constant 0 : index
    %7 = vector.load %arg1[%c272, %c0_6] : memref<320x128xf32, #tpu.memory_space<vmem>>, vector<32x3xf32>
    %c304 = arith.constant 304 : index
    %c0_7 = arith.constant 0 : index
    %8 = vector.load %arg1[%c304, %c0_7] : memref<320x128xf32, #tpu.memory_space<vmem>>, vector<16x32xf32>
    %c0_8 = arith.constant 0 : index
    %c0_9 = arith.constant 0 : index
    %9 = vector.load %arg1[%c0_8, %c0_9] : memref<320x128xf32, #tpu.memory_space<vmem>>, vector<1x32xf32>
    %c1 = arith.constant 1 : index
    %c0_10 = arith.constant 0 : index
    %10 = vector.load %arg1[%c1, %c0_10] : memref<320x128xf32, #tpu.memory_space<vmem>>, vector<1x64xf32>
    %c2 = arith.constant 2 : index
    %c0_11 = arith.constant 0 : index
    %11 = vector.load %arg1[%c2, %c0_11] : memref<320x128xf32, #tpu.memory_space<vmem>>, vector<1x64xf32>
    %c3 = arith.constant 3 : index
    %c0_12 = arith.constant 0 : index
    %12 = vector.load %arg1[%c3, %c0_12] : memref<320x128xf32, #tpu.memory_space<vmem>>, vector<1x32xf32>
    %c4 = arith.constant 4 : index
    %c0_13 = arith.constant 0 : index
    %13 = vector.load %arg1[%c4, %c0_13] : memref<320x128xf32, #tpu.memory_space<vmem>>, vector<1x32xf32>
    %c5 = arith.constant 5 : index
    %c0_14 = arith.constant 0 : index
    %14 = vector.load %arg1[%c5, %c0_14] : memref<320x128xf32, #tpu.memory_space<vmem>>, vector<1x32xf32>
    %c6 = arith.constant 6 : index
    %c0_15 = arith.constant 0 : index
    %15 = vector.load %arg1[%c6, %c0_15] : memref<320x128xf32, #tpu.memory_space<vmem>>, vector<1x3xf32>
    %c0_16 = arith.constant 0 : index
    %c0_17 = arith.constant 0 : index
    %16 = vector.load %arg0[%c0_16, %c0_17] : memref<128x3xf32, #tpu.memory_space<vmem>>, vector<128x3xf32>
    %cst = arith.constant dense<0.000000e+00> : vector<128x32xf32>
    %17 = tpu.matmul %16, %0, %cst {dimension_numbers = #tpu.dot_dimension_numbers<[1], [0], [0], [1], [0, 0, 1, 1], [], []>} : vector<128x3xf32>, vector<3x32xf32>, vector<128x32xf32> -> vector<128x32xf32>
    %18 = vector.broadcast %9 : vector<1x32xf32> to vector<128x32xf32>
    %19 = arith.addf %17, %18 : vector<128x32xf32>
    %cst_18 = arith.constant 0.000000e+00 : f32
    %20 = vector.broadcast %cst_18 : f32 to vector<128x32xf32>
    %21 = arith.maximumf %19, %20 : vector<128x32xf32>
    %cst_19 = arith.constant dense<0.000000e+00> : vector<128x64xf32>
    %22 = tpu.matmul %21, %1, %cst_19 {dimension_numbers = #tpu.dot_dimension_numbers<[1], [0], [0], [1], [0, 0, 1, 1], [], []>} : vector<128x32xf32>, vector<32x64xf32>, vector<128x64xf32> -> vector<128x64xf32>
    %23 = vector.broadcast %10 : vector<1x64xf32> to vector<128x64xf32>
    %24 = arith.addf %22, %23 : vector<128x64xf32>
    %cst_20 = arith.constant 0.000000e+00 : f32
    %25 = vector.broadcast %cst_20 : f32 to vector<128x64xf32>
    %26 = arith.maximumf %24, %25 : vector<128x64xf32>
    %cst_21 = arith.constant dense<0.000000e+00> : vector<128x64xf32>
    %27 = tpu.matmul %26, %2, %cst_21 {dimension_numbers = #tpu.dot_dimension_numbers<[1], [0], [0], [1], [0, 0, 1, 1], [], []>} : vector<128x64xf32>, vector<64x64xf32>, vector<128x64xf32> -> vector<128x64xf32>
    %28 = vector.broadcast %11 : vector<1x64xf32> to vector<128x64xf32>
    %29 = arith.addf %27, %28 : vector<128x64xf32>
    %30 = vector.shape_cast %29 : vector<128x64xf32> to vector<2x64x64xf32>
    %cst_22 = arith.constant dense<0xFF800000> : vector<2x64xf32>
    %31 = vector.multi_reduction <maximumf>, %30, %cst_22 [1] : vector<2x64x64xf32> to vector<2x64xf32>
    %c0_23 = arith.constant 0 : index
    %c0_24 = arith.constant 0 : index
    %32 = vector.load %arg3[%c0_23, %c0_24] : memref<2x64xf32, #tpu.memory_space<vmem>>, vector<2x64xf32>
    tpu.vector_store %arg3[%c0_23, %c0_24], %31 {strides = array<i32>} : memref<2x64xf32, #tpu.memory_space<vmem>>, vector<2x64xf32>,
    %cst_25 = arith.constant dense<0.000000e+00> : vector<2x64xf32>
    %33 = tpu.matmul %31, %3, %cst_25 {dimension_numbers = #tpu.dot_dimension_numbers<[1], [0], [0], [1], [0, 0, 1, 1], [], []>} : vector<2x64xf32>, vector<64x64xf32>, vector<2x64xf32> -> vector<2x64xf32>
    %34 = vector.extract_strided_slice %33 {offsets = [0, 0], sizes = [2, 32], strides = [1, 1]} : vector<2x64xf32> to vector<2x32xf32>
    %35 = vector.extract_strided_slice %33 {offsets = [0, 32], sizes = [2, 32], strides = [1, 1]} : vector<2x64xf32> to vector<2x32xf32>
    %36 = vector.shape_cast %34 : vector<2x32xf32> to vector<2x1x32xf32>
    %37 = vector.shape_cast %8 : vector<16x32xf32> to vector<1x16x32xf32>
    %38 = vector.broadcast %36 : vector<2x1x32xf32> to vector<2x16x32xf32>
    %39 = vector.broadcast %37 : vector<1x16x32xf32> to vector<2x16x32xf32>
    %40 = arith.addf %38, %39 : vector<2x16x32xf32>
    %cst_26 = arith.constant 0.000000e+00 : f32
    %41 = vector.broadcast %cst_26 : f32 to vector<2x16x32xf32>
    %42 = arith.maximumf %40, %41 : vector<2x16x32xf32>
    %43 = vector.shape_cast %42 : vector<2x16x32xf32> to vector<32x32xf32>
    %cst_27 = arith.constant dense<0.000000e+00> : vector<32x32xf32>
    %44 = tpu.matmul %43, %4, %cst_27 {dimension_numbers = #tpu.dot_dimension_numbers<[1], [0], [0], [1], [0, 0, 1, 1], [], []>} : vector<32x32xf32>, vector<32x32xf32>, vector<32x32xf32> -> vector<32x32xf32>
    %45 = vector.broadcast %12 : vector<1x32xf32> to vector<32x32xf32>
    %46 = arith.addf %44, %45 : vector<32x32xf32>
    %cst_28 = arith.constant 0.000000e+00 : f32
    %47 = vector.broadcast %cst_28 : f32 to vector<32x32xf32>
    %48 = arith.maximumf %46, %47 : vector<32x32xf32>
    %49 = vector.shape_cast %35 : vector<2x32xf32> to vector<2x1x32xf32>
    %50 = vector.shape_cast %49 : vector<2x1x32xf32> to vector<2x1x32xf32>
    %51 = vector.broadcast %50 : vector<2x1x32xf32> to vector<2x16x32xf32>
    %52 = vector.shape_cast %51 : vector<2x16x32xf32> to vector<32x32xf32>
    %cst_29 = arith.constant dense<0.000000e+00> : vector<32x32xf32>
    %53 = tpu.matmul %48, %5, %cst_29 {dimension_numbers = #tpu.dot_dimension_numbers<[1], [0], [0], [1], [0, 0, 1, 1], [], []>} : vector<32x32xf32>, vector<32x32xf32>, vector<32x32xf32> -> vector<32x32xf32>
    %54 = arith.addf %52, %53 : vector<32x32xf32>
    %55 = vector.broadcast %13 : vector<1x32xf32> to vector<32x32xf32>
    %56 = arith.addf %54, %55 : vector<32x32xf32>
    %cst_30 = arith.constant 0.000000e+00 : f32
    %57 = vector.broadcast %cst_30 : f32 to vector<32x32xf32>
    %58 = arith.maximumf %56, %57 : vector<32x32xf32>
    %cst_31 = arith.constant dense<0.000000e+00> : vector<32x32xf32>
    %59 = tpu.matmul %58, %6, %cst_31 {dimension_numbers = #tpu.dot_dimension_numbers<[1], [0], [0], [1], [0, 0, 1, 1], [], []>} : vector<32x32xf32>, vector<32x32xf32>, vector<32x32xf32> -> vector<32x32xf32>
    %60 = vector.broadcast %14 : vector<1x32xf32> to vector<32x32xf32>
    %61 = arith.addf %59, %60 : vector<32x32xf32>
    %cst_32 = arith.constant 0.000000e+00 : f32
    %62 = vector.broadcast %cst_32 : f32 to vector<32x32xf32>
    %63 = arith.maximumf %61, %62 : vector<32x32xf32>
    %cst_33 = arith.constant dense<0.000000e+00> : vector<32x3xf32>
    %64 = tpu.matmul %63, %7, %cst_33 {dimension_numbers = #tpu.dot_dimension_numbers<[1], [0], [0], [1], [0, 0, 1, 1], [], []>} : vector<32x32xf32>, vector<32x3xf32>, vector<32x3xf32> -> vector<32x3xf32>
    %65 = vector.broadcast %15 : vector<1x3xf32> to vector<32x3xf32>
    %66 = arith.addf %64, %65 : vector<32x3xf32>
    %c0_34 = arith.constant 0 : index
    %c0_35 = arith.constant 0 : index
    %67 = vector.load %arg2[%c0_34, %c0_35] : memref<32x3xf32, #tpu.memory_space<vmem>>, vector<32x3xf32>
    tpu.vector_store %arg2[%c0_34, %c0_35], %66 {strides = array<i32>} : memref<32x3xf32, #tpu.memory_space<vmem>>, vector<32x3xf32>,
    return
  }
}

</mosaic_0001>

<bundles_post_ra>
// kernel: reconstruction_net.1
= control target key start
LH: loop header
LB: loop body
LE: loop exit
PB: predicated region body
PF: predicated region fallthrough
CT: control target
= control target key end

     0   :  { %9 = vsyncpa [#allocation3], 0  ;;  %s1950_s0 = inlined_call_operand.vmem [shape: f32[128,3], index: 0, kind: input, shape index: {}]   ;;  %s1951_s1 = inlined_call_operand.hbm [shape: f32[320,128], index: 1, kind: input, shape index: {}]   ;;  %s1952_s2 = inlined_call_operand.vmem [shape: f32[32,3], index: 2, kind: output, shape index: {0}]   ;;  %s1953_s3 = inlined_call_operand.hbm [shape: f32[2,64], index: 3, kind: output, shape index: {1}]  }
   0x1   :  { %10 = vsyncpa [#allocation4], 0  ;;  %s1758_s12 = smov [#allocation2]  }
   0x2   :  { %s18_s13 = sshll.u32 %s1758_s12, 4  ;;  %s19_s13 = int_to_ptr.vmem [resolvable:$true] %s18_s13 }
   0x3   :  { %s1722_s14 = scalar_lea.vmem %s19_s13, 5120  ;;  %p1727_p1 = scmp.lt.s32.totalorder %s19_s13, %s19_s13 }
   0x4   :  { %p1723_p0 = scmp.ne.s32.totalorder %s19_s13, %s1722_s14  ;;  %p1728_p2 = scmp.lt.s32.totalorder %s1722_s14, %s1722_s14 }
   0x6   :  { %p1729_p3 = por %p1728_p2, %p1727_p1 }
   0x8   :  { %p1730_p4 = pnand %p1729_p3, %p1723_p0 }
   0xa   :  { %1733 = shalt.err (!%p1730_p4)
}
   0xb   :  { %s1759_s15 = smov 128   ;;  %s1760_s16 = smov 8  }
   0xc   :  { %24 = dma.hbm_to_vmem [thread:$0]  %s1951_s1, 5120, %s19_s13, [#allocation3], %s1759_s15, %s1759_s15, %s1760_s16  }
   0xd   :  { %1754 = dma.done.wait [#allocation3], 5120  }
   0xe   :  { %1755 = vsyncadd [#allocation3], 4294962176  ;;  %vm143_vm0 = vcmask 1042432   ;;  %vm94_vm1 = vcmask 23552   ;;  %v28_v0 = vld [vmem:[#allocation2 + $0x8] sm:$0x7] }
   0xf   :  { %v74_v1 = vld [vmem:[%s1950_s0] sm:$0xff]  ;;  %v75_v2 = vld [vmem:[%s1950_s0 + $0x8] sm:$0xff]  ;;  %1532 = vmatprep.subr.msk.mxu0 %vm143_vm0, %v28_v0  ;;  %v76_v3 = vld [vmem:[%s1950_s0 + $0x10] sm:$0xff]  ;;  %vm312_vm2 = vcmask 261120   ;;  %vm526_vm3 = vcmask 523264   ;;  %vm1762_vm4 = vmmov 0  }
  0x10   :  { %1534 = vmatprep.mubr.msk.f32.mxu0 %vm94_vm1, %v74_v1  ;;  %1533 = vmatpush3.msk.msra.mxu0 %vm143_vm0, %v28_v0  ;;  %v77_v4 = vld [vmem:[%s1950_s0 + $0x18] sm:$0xff]  ;;  %v78_v5 = vld [vmem:[%s1950_s0 + $0x20] sm:$0xff]  ;;  %v79_v6 = vld [vmem:[%s1950_s0 + $0x28] sm:$0xff]  ;;  %vm764_vm5 = vcmask 1041409   ;;  %vm767_vm6 = vcmask 517120   ;;  %s1765_s23 = smov 96  }
  0x11   :  { %1535 = vmatmul.mubr.msk.f32.vlgmr.msra.gmra.mxu0 %vm94_vm1, %v75_v2  ;;  %v80_v7 = vld [vmem:[%s1950_s0 + $0x30] sm:$0xff]  ;;  %v81_v8 = vld [vmem:[%s1950_s0 + $0x38] sm:$0xff]  ;;  %v82_v9 = vld [vmem:[%s1950_s0 + $0x40] sm:$0xff]  ;;  %s1766_s24 = smov [#allocation5]  }
  0x12   :  { %1537 = vmatprep.mubr.msk.f32.mxu0 %vm94_vm1, %v76_v3  ;;  %v83_v10 = vld [vmem:[%s1950_s0 + $0x48] sm:$0xff]  ;;  %v84_v11 = vld [vmem:[%s1950_s0 + $0x50] sm:$0xff]  ;;  %v85_v12 = vld [vmem:[%s1950_s0 + $0x58] sm:$0xff]  ;;  %s1346_s1 = sshll.u32 %s1766_s24, 4  ;;  %s1347_s1 = int_to_ptr.vmem [resolvable:$true] %s1346_s1 }
  0x13   :  { %v86_v13 = vld [vmem:[%s1950_s0 + $0x60] sm:$0xff]  ;;  %v87_v14 = vld [vmem:[%s1950_s0 + $0x68] sm:$0xff]  ;;  %v88_v15 = vld [vmem:[%s1950_s0 + $0x70] sm:$0xff]  ;;  %s1734_s25 = scalar_lea.vmem %s1347_s1, 32  ;;  %p1739_p6 = scmp.lt.s32.totalorder %s1347_s1, %s1347_s1 }
  0x14   :  { %v89_v16 = vld [vmem:[%s1950_s0 + $0x78] sm:$0xff]  ;;  %v32_v17 = vld [vmem:[#allocation2 + $0x28] sm:$0xff]  ;;  %v31_v18 = vld [vmem:[#allocation2 + $0x20] sm:$0xff]  ;;  %s1764_s0 = smov 32   ;;  %p1735_p5 = scmp.ne.s32.totalorder %s1347_s1, %s1734_s25 }
  0x15   :  { %1538 = vmatmul.mubr.msk.f32.gmra.mxu0 %vm94_vm1, %v77_v4  ;;  %1558 = vmatprep.subr.mxu1 %v32_v17  ;;  %v30_v19 = vld [vmem:[#allocation2 + $0x18] sm:$0xff]  ;;  %v29_v20 = vld [vmem:[#allocation2 + $0x10] sm:$0xff]  ;;  %v40_v21 = vld [vmem:[#allocation2 + $0x68] sm:$0xff]  ;;  %p1740_p7 = scmp.lt.s32.totalorder %s1734_s25, %s1734_s25 }
  0x16   :  { %1540 = vmatprep.mubr.msk.f32.mxu0 %vm94_vm1, %v78_v5  ;;  %1559 = vmatpush3.msra.mxu1 %v32_v17  ;;  %v39_v22 = vld [vmem:[#allocation2 + $0x60] sm:$0xff]  ;;  %v38_v23 = vld [vmem:[#allocation2 + $0x58] sm:$0xff]  ;;  %v37_v24 = vld [vmem:[#allocation2 + $0x50] sm:$0xff] }
  0x17   :  { %1560 = vmatprep.subr.mxu1 %v31_v18  ;;  %1590 = vmatprep.subr.mxu0 %v40_v21  ;;  %v36_v25 = vld [vmem:[#allocation2 + $0x48] sm:$0xff]  ;;  %v35_v26 = vld [vmem:[#allocation2 + $0x40] sm:$0xff]  ;;  %v34_v27 = vld [vmem:[#allocation2 + $0x38] sm:$0xff]  ;;  %p1741_p8 = por %p1740_p7, %p1739_p6 }
  0x18   :  { %1561 = vmatpush3.msra.mxu1 %v31_v18  ;;  %1591 = vmatpush3.msra.mxu0 %v40_v21  ;;  %v1357_v28 = vld [vmem:[#allocation2] ss:$0 sm:$0xff] }
  0x19   :  { %1541 = vmatmul.mubr.msk.f32.gmra.mxu0 %vm94_vm1, %v79_v6  ;;  %1562 = vmatprep.subr.mxu1 %v30_v19  ;;  %p1742_p9 = pnand %p1741_p8, %p1735_p5 }
  0x1a   :  { %1543 = vmatprep.mubr.msk.f32.mxu0 %vm94_vm1, %v80_v7  ;;  %1563 = vmatpush3.msra.mxu1 %v30_v19 }
  0x1b   :  { %1564 = vmatprep.subr.mxu1 %v29_v20  ;;  %1592 = vmatprep.subr.mxu0 %v39_v22 }
  0x1c   :  { %1565 = vmatpush3.msra.mxu1 %v29_v20  ;;  %1593 = vmatpush3.msra.mxu0 %v39_v22 }
  0x1d   :  { %1544 = vmatmul.mubr.msk.f32.gmra.mxu0 %vm94_vm1, %v81_v8  ;;  %1594 = vmatprep.subr.mxu0 %v38_v23 }
  0x1e   :  { %1546 = vmatprep.mubr.msk.f32.mxu0 %vm94_vm1, %v82_v9  ;;  %1595 = vmatpush3.msra.mxu0 %v38_v23 }
  0x1f   :  { %1596 = vmatprep.subr.mxu0 %v37_v24 }
  0x20   :  { %1597 = vmatpush3.msra.mxu0 %v37_v24 }
  0x21   :  { %1547 = vmatmul.mubr.msk.f32.gmra.mxu0 %vm94_vm1, %v83_v10  ;;  %1598 = vmatprep.subr.mxu0 %v36_v25 }
  0x22   :  { %1549 = vmatprep.mubr.msk.f32.mxu0 %vm94_vm1, %v84_v11  ;;  %1599 = vmatpush3.msra.mxu0 %v36_v25 }
  0x23   :  { %1600 = vmatprep.subr.mxu0 %v35_v26 }
  0x24   :  { %1601 = vmatpush3.msra.mxu0 %v35_v26 }
  0x25   :  { %1550 = vmatmul.mubr.msk.f32.gmra.mxu0 %vm94_vm1, %v85_v12  ;;  %1602 = vmatprep.subr.mxu0 %v34_v27 }
  0x26   :  { %1552 = vmatprep.mubr.msk.f32.mxu0 %vm94_vm1, %v86_v13  ;;  %1603 = vmatpush3.msra.mxu0 %v34_v27  ;;  %v33_v13 = vld [vmem:[#allocation2 + $0x30] sm:$0xff] }
  0x27   :  { %1604 = vmatprep.subr.mxu0 %v33_v13 }
  0x28   :  { %1605 = vmatpush3.msra.mxu0 %v33_v13 }
  0x29   :  { %1553 = vmatmul.mubr.msk.f32.gmra.mxu0 %vm94_vm1, %v87_v14  ;;  %v1375_v14 = vld [vmem:[#allocation2 + $0x1] ss:$0 sm:$0xff] }
  0x2a   :  { %1555 = vmatprep.mubr.msk.f32.mxu0 %vm94_vm1, %v88_v15 }
  0x2d   :  { %1556 = vmatmul.mubr.msk.f32.gmra.mxu0 %vm94_vm1, %v89_v16 }
  0xd1   :  { %v1536_v29 = vpop.f32.mrf.mxu0 }
  0xd2   :  { %v219_v30 = vadd.f32 %v1536_v29, %v1357_v28 }
  0xd3   :  { %v213_v31 = vpop.f32.mrf.mxu0 }
  0xd4   :  { %v214_v32 = vadd.f32 %v1357_v28, %v213_v31  ;;  %v293_v35 = vmax.f32 %v219_v30, 0.0 }
  0xd5   :  { %v1539_v33 = vpop.f32.mrf.mxu0 }
  0xd6   :  { %v292_v34 = vmax.f32 %v214_v32, 0.0  ;;  %v229_v36 = vadd.f32 %v1539_v33, %v1357_v28 }
  0xd7   :  { %v223_v37 = vpop.f32.mrf.mxu0 }
  0xd8   :  { %v224_v38 = vadd.f32 %v1357_v28, %v223_v37  ;;  %1566 = vmatprep.mubr.msk.f32.mxu1 %vm312_vm2, %v292_v34  ;;  %v295_v41 = vmax.f32 %v229_v36, 0.0 }
  0xd9   :  { %v1542_v39 = vpop.f32.mrf.mxu0  ;;  %1567 = vmatmul.mubr.msk.f32.vlgmr.msra.gmra.mxu1 %vm312_vm2, %v293_v35 }
  0xda   :  { %v294_v40 = vmax.f32 %v224_v38, 0.0  ;;  %v239_v42 = vadd.f32 %v1542_v39, %v1357_v28 }
  0xdb   :  { %v233_v43 = vpop.f32.mrf.mxu0 }
  0xdc   :  { %v234_v44 = vadd.f32 %v1357_v28, %v233_v43  ;;  %1569 = vmatprep.mubr.msk.f32.mxu1 %vm312_vm2, %v294_v40  ;;  %v297_v47 = vmax.f32 %v239_v42, 0.0 }
  0xdd   :  { %v1545_v45 = vpop.f32.mrf.mxu0  ;;  %1570 = vmatmul.mubr.msk.f32.gmra.mxu1 %vm312_vm2, %v295_v41 }
  0xde   :  { %v296_v46 = vmax.f32 %v234_v44, 0.0  ;;  %v249_v48 = vadd.f32 %v1545_v45, %v1357_v28 }
  0xdf   :  { %v243_v49 = vpop.f32.mrf.mxu0 }
  0xe0   :  { %v244_v50 = vadd.f32 %v1357_v28, %v243_v49  ;;  %1572 = vmatprep.mubr.msk.f32.mxu1 %vm312_vm2, %v296_v46  ;;  %v299_v53 = vmax.f32 %v249_v48, 0.0 }
  0xe1   :  { %v1548_v51 = vpop.f32.mrf.mxu0  ;;  %1573 = vmatmul.mubr.msk.f32.gmra.mxu1 %vm312_vm2, %v297_v47 }
  0xe2   :  { %v298_v52 = vmax.f32 %v244_v50, 0.0  ;;  %v259_v54 = vadd.f32 %v1548_v51, %v1357_v28 }
  0xe3   :  { %v253_v55 = vpop.f32.mrf.mxu0 }
  0xe4   :  { %v254_v56 = vadd.f32 %v1357_v28, %v253_v55  ;;  %1575 = vmatprep.mubr.msk.f32.mxu1 %vm312_vm2, %v298_v52  ;;  %v301_v59 = vmax.f32 %v259_v54, 0.0 }
  0xe5   :  { %v1551_v57 = vpop.f32.mrf.mxu0  ;;  %1576 = vmatmul.mubr.msk.f32.gmra.mxu1 %vm312_vm2, %v299_v53 }
  0xe6   :  { %v300_v58 = vmax.f32 %v254_v56, 0.0  ;;  %v269_v60 = vadd.f32 %v1551_v57, %v1357_v28 }
  0xe7   :  { %v263_v61 = vpop.f32.mrf.mxu0 }
  0xe8   :  { %v264_v62 = vadd.f32 %v1357_v28, %v263_v61  ;;  %1578 = vmatprep.mubr.msk.f32.mxu1 %vm312_vm2, %v300_v58  ;;  %v303_v1 = vmax.f32 %v269_v60, 0.0 }
  0xe9   :  { %v1554_v63 = vpop.f32.mrf.mxu0  ;;  %1579 = vmatmul.mubr.msk.f32.gmra.mxu1 %vm312_vm2, %v301_v59 }
  0xea   :  { %v302_v0 = vmax.f32 %v264_v62, 0.0  ;;  %v279_v2 = vadd.f32 %v1554_v63, %v1357_v28  ;;  %v48_v63 = vld [vmem:[#allocation2 + $0xa8] sm:$0xff] }
  0xeb   :  { %v273_v3 = vpop.f32.mrf.mxu0 }
  0xec   :  { %v274_v4 = vadd.f32 %v1357_v28, %v273_v3  ;;  %1581 = vmatprep.mubr.msk.f32.mxu1 %vm312_vm2, %v302_v0  ;;  %v305_v7 = vmax.f32 %v279_v2, 0.0  ;;  %v1761_v0 = vmov 0.0   ;;  %v46_v2 = vld [vmem:[#allocation2 + $0x98] sm:$0xff]  ;;  %v45_v3 = vld [vmem:[#allocation2 + $0x90] sm:$0xff] }
  0xed   :  { %v1557_v5 = vpop.f32.mrf.mxu0  ;;  %1582 = vmatmul.mubr.msk.f32.gmra.mxu1 %vm312_vm2, %v303_v1  ;;  %1630 = vmatprep.subr.mxu1 %v1761_v0  ;;  %v47_v1 = vld [vmem:[#allocation2 + $0xa0] sm:$0xff] }
  0xee   :  { %v304_v6 = vmax.f32 %v274_v4, 0.0  ;;  %v289_v8 = vadd.f32 %v1557_v5, %v1357_v28  ;;  %1631 = vmatpush3.msra.mxu1 %v48_v63  ;;  %v44_v4 = vld [vmem:[#allocation2 + $0x88] sm:$0xff]  ;;  %v43_v5 = vld [vmem:[#allocation2 + $0x80] sm:$0xff] }
  0xef   :  { %v283_v9 = vpop.f32.mrf.mxu0  ;;  %1632 = vmatprep.subr.mxu1 %v1761_v0 }
  0xf0   :  { %v284_v10 = vadd.f32 %v1357_v28, %v283_v9  ;;  %1584 = vmatprep.mubr.msk.f32.mxu1 %vm312_vm2, %v304_v6  ;;  %v307_v12 = vmax.f32 %v289_v8, 0.0  ;;  %1633 = vmatpush3.msra.mxu1 %v47_v1  ;;  %v42_v6 = vld [vmem:[#allocation2 + $0x78] sm:$0xff] }
  0xf1   :  { %1585 = vmatmul.mubr.msk.f32.gmra.mxu1 %vm312_vm2, %v305_v7  ;;  %1634 = vmatprep.subr.mxu1 %v1761_v0  ;;  %v41_v7 = vld [vmem:[#allocation2 + $0x70] sm:$0xff] }
  0xf2   :  { %v306_v11 = vmax.f32 %v284_v10, 0.0  ;;  %1635 = vmatpush3.msra.mxu1 %v46_v2 }
  0xf3   :  { %1636 = vmatprep.subr.mxu1 %v1761_v0 }
  0xf4   :  { %1587 = vmatprep.mubr.msk.f32.mxu1 %vm312_vm2, %v306_v11  ;;  %1637 = vmatpush3.msra.mxu1 %v45_v3 }
  0xf5   :  { %1588 = vmatmul.mubr.msk.f32.gmra.mxu1 %vm312_vm2, %v307_v12  ;;  %1638 = vmatprep.subr.mxu1 %v1761_v0  ;;  %v1392_v12 = vld [vmem:[#allocation2 + $0x2] ss:$0 sm:$0xff] }
  0xf6   :  { %1639 = vmatpush3.msra.mxu1 %v44_v4  ;;  %1646 = vmatprep.mubr.msk.f32.mxu1 %vm1762_vm4, %v1761_v0 }
  0xf7   :  { %1640 = vmatprep.subr.mxu1 %v1761_v0 }
  0xf8   :  { %1641 = vmatpush3.msra.mxu1 %v43_v5 }
  0xf9   :  { %1642 = vmatprep.subr.mxu1 %v1761_v0 }
  0xfa   :  { %1643 = vmatpush3.msra.mxu1 %v42_v6 }
  0xfb   :  { %1644 = vmatprep.subr.mxu1 %v1761_v0 }
  0xfc   :  { %1645 = vmatpush3.msra.mxu1 %v41_v7 }
 0x199   :  { %v1568_v15 = vpop.f32.mrf.mxu1 }
 0x19a   :  { %v433_v16 = vadd.f32 %v1568_v15, %v1375_v14 }
 0x19b   :  { %v427_v17 = vpop.f32.mrf.mxu1 }
 0x19c   :  { %v428_v18 = vadd.f32 %v1375_v14, %v427_v17  ;;  %v507_v21 = vmax.f32 %v433_v16, 0.0 }
 0x19d   :  { %v1571_v19 = vpop.f32.mrf.mxu1 }
 0x19e   :  { %v506_v20 = vmax.f32 %v428_v18, 0.0  ;;  %v443_v22 = vadd.f32 %v1571_v19, %v1375_v14 }
 0x19f   :  { %v437_v23 = vpop.f32.mrf.mxu1 }
 0x1a0   :  { %v438_v24 = vadd.f32 %v1375_v14, %v437_v23  ;;  %1606 = vmatprep.mubr.msk.f32.mxu0 %vm526_vm3, %v506_v20  ;;  %v509_v27 = vmax.f32 %v443_v22, 0.0 }
 0x1a1   :  { %v1574_v25 = vpop.f32.mrf.mxu1  ;;  %1607 = vmatmul.mubr.msk.f32.vlgmr.msra.gmra.mxu0 %vm526_vm3, %v507_v21 }
 0x1a2   :  { %v508_v26 = vmax.f32 %v438_v24, 0.0  ;;  %v453_v28 = vadd.f32 %v1574_v25, %v1375_v14 }
 0x1a3   :  { %v447_v29 = vpop.f32.mrf.mxu1 }
 0x1a4   :  { %v448_v30 = vadd.f32 %v1375_v14, %v447_v29  ;;  %1609 = vmatprep.mubr.msk.f32.mxu0 %vm526_vm3, %v508_v26  ;;  %v511_v33 = vmax.f32 %v453_v28, 0.0 }
 0x1a5   :  { %v1577_v31 = vpop.f32.mrf.mxu1  ;;  %1610 = vmatmul.mubr.msk.f32.gmra.mxu0 %vm526_vm3, %v509_v27 }
 0x1a6   :  { %v510_v32 = vmax.f32 %v448_v30, 0.0  ;;  %v463_v34 = vadd.f32 %v1577_v31, %v1375_v14 }
 0x1a7   :  { %v457_v35 = vpop.f32.mrf.mxu1 }
 0x1a8   :  { %v458_v36 = vadd.f32 %v1375_v14, %v457_v35  ;;  %1612 = vmatprep.mubr.msk.f32.mxu0 %vm526_vm3, %v510_v32  ;;  %v513_v39 = vmax.f32 %v463_v34, 0.0 }
 0x1a9   :  { %v1580_v37 = vpop.f32.mrf.mxu1  ;;  %1613 = vmatmul.mubr.msk.f32.gmra.mxu0 %vm526_vm3, %v511_v33 }
 0x1aa   :  { %v512_v38 = vmax.f32 %v458_v36, 0.0  ;;  %v473_v40 = vadd.f32 %v1580_v37, %v1375_v14 }
 0x1ab   :  { %v467_v41 = vpop.f32.mrf.mxu1 }
 0x1ac   :  { %v468_v42 = vadd.f32 %v1375_v14, %v467_v41  ;;  %1615 = vmatprep.mubr.msk.f32.mxu0 %vm526_vm3, %v512_v38  ;;  %v515_v45 = vmax.f32 %v473_v40, 0.0 }
 0x1ad   :  { %v1583_v43 = vpop.f32.mrf.mxu1  ;;  %1616 = vmatmul.mubr.msk.f32.gmra.mxu0 %vm526_vm3, %v513_v39 }
 0x1ae   :  { %v514_v44 = vmax.f32 %v468_v42, 0.0  ;;  %v483_v46 = vadd.f32 %v1583_v43, %v1375_v14 }
 0x1af   :  { %v477_v47 = vpop.f32.mrf.mxu1 }
 0x1b0   :  { %v478_v48 = vadd.f32 %v1375_v14, %v477_v47  ;;  %1618 = vmatprep.mubr.msk.f32.mxu0 %vm526_vm3, %v514_v44  ;;  %v517_v51 = vmax.f32 %v483_v46, 0.0 }
 0x1b1   :  { %v1586_v49 = vpop.f32.mrf.mxu1  ;;  %1619 = vmatmul.mubr.msk.f32.gmra.mxu0 %vm526_vm3, %v515_v45 }
 0x1b2   :  { %v516_v50 = vmax.f32 %v478_v48, 0.0  ;;  %v493_v52 = vadd.f32 %v1586_v49, %v1375_v14 }
 0x1b3   :  { %v487_v53 = vpop.f32.mrf.mxu1 }
 0x1b4   :  { %v488_v54 = vadd.f32 %v1375_v14, %v487_v53  ;;  %1621 = vmatprep.mubr.msk.f32.mxu0 %vm526_vm3, %v516_v50  ;;  %v519_v57 = vmax.f32 %v493_v52, 0.0 }
 0x1b5   :  { %v1589_v55 = vpop.f32.mrf.mxu1  ;;  %1622 = vmatmul.mubr.msk.f32.gmra.mxu0 %vm526_vm3, %v517_v51 }
 0x1b6   :  { %v518_v56 = vmax.f32 %v488_v54, 0.0  ;;  %v503_v58 = vadd.f32 %v1589_v55, %v1375_v14 }
 0x1b7   :  { %v497_v59 = vpop.f32.mrf.mxu1 }
 0x1b8   :  { %v498_v60 = vadd.f32 %v1375_v14, %v497_v59  ;;  %1624 = vmatprep.mubr.msk.f32.mxu0 %vm526_vm3, %v518_v56  ;;  %v521_v62 = vmax.f32 %v503_v58, 0.0 }
 0x1b9   :  { %1625 = vmatmul.mubr.msk.f32.gmra.mxu0 %vm526_vm3, %v519_v57 }
 0x1ba   :  { %v520_v61 = vmax.f32 %v498_v60, 0.0 }
 0x1bc   :  { %1627 = vmatprep.mubr.msk.f32.mxu0 %vm526_vm3, %v520_v61 }
 0x1bd   :  { %1628 = vmatmul.mubr.msk.f32.gmra.mxu0 %vm526_vm3, %v521_v62 }
 0x261   :  { %v1608_v8 = vpop.f32.mrf.mxu0 }
 0x262   :  { %v647_v20 = vadd.f32 %v1608_v8, %v1392_v12 }
 0x263   :  { %v641_v9 = vpop.f32.mrf.mxu0 }
 0x264   :  { %v642_v15 = vadd.f32 %v1392_v12, %v641_v9  ;;  %v721_v31 = vsel %vm526_vm3, %v647_v20, -inf  ;;  %v52_v20 = vld [vmem:[#allocation2 + $0xc8] sm:$0xff] }
 0x265   :  { %v1611_v10 = vpop.f32.mrf.mxu0  ;;  %1649 = vmatprep.subr.mxu1 %v52_v20 }
 0x266   :  { %v657_v17 = vadd.f32 %v1611_v10, %v1392_v12  ;;  %v720_v23 = vsel %vm526_vm3, %v642_v15, -inf }
 0x267   :  { %v651_v11 = vpop.f32.mrf.mxu0 }
 0x268   :  { %v652_v14 = vadd.f32 %v1392_v12, %v651_v11  ;;  %v724_v25 = vsel %vm526_vm3, %v657_v17, -inf }
 0x269   :  { %v1614_v13 = vpop.f32.mrf.mxu0  ;;  %v725_v34 = vmax.f32 %v721_v31, %v724_v25  ;;  %v1763_v25 = vmov 1966171168  }
 0x26a   :  { %v722_v21 = vsel %vm526_vm3, %v652_v14, -inf  ;;  %v667_v22 = vadd.f32 %v1614_v13, %v1392_v12 }
 0x26b   :  { %v661_v16 = vpop.f32.mrf.mxu0  ;;  %v723_v29 = vmax.f32 %v720_v23, %v722_v21  ;;  %v51_v21 = vld [vmem:[#allocation2 + $0xc0] sm:$0xff]  ;;  %v49_v23 = vld [vmem:[#allocation2 + $0xb0] sm:$0xff] }
 0x26c   :  { %v662_v18 = vadd.f32 %v1392_v12, %v661_v16  ;;  %v728_v32 = vsel %vm526_vm3, %v667_v22, -inf  ;;  %v50_v22 = vld [vmem:[#allocation2 + $0xb8] sm:$0xff] }
 0x26d   :  { %v1617_v19 = vpop.f32.mrf.mxu0  ;;  %v729_v38 = vmax.f32 %v725_v34, %v728_v32 }
 0x26e   :  { %v726_v26 = vsel %vm526_vm3, %v662_v18, -inf  ;;  %v677_v27 = vadd.f32 %v1617_v19, %v1392_v12 }
 0x26f   :  { %v671_v24 = vpop.f32.mrf.mxu0  ;;  %v727_v35 = vmax.f32 %v723_v29, %v726_v26  ;;  %v843_v26 = vunpack.c.l.s4 %v1763_v25 }
 0x270   :  { %v672_v28 = vadd.f32 %v1392_v12, %v671_v24  ;;  %v732_v37 = vsel %vm526_vm3, %v677_v27, -inf  ;;  %v56_v24 = vld [vmem:[#allocation2 + $0xe8] sm:$0xff]  ;;  %v845_v27 = vlaneseq }
 0x271   :  { %v1620_v30 = vpop.f32.mrf.mxu0  ;;  %v733_v41 = vmax.f32 %v729_v38, %v732_v37  ;;  %v65_v37 = vld [vmem:[#allocation2 + $0x130] sm:$0xff]  ;;  %v66_v38 = vld [vmem:[#allocation2 + $0x138] sm:$0xff] }
 0x272   :  { %v730_v33 = vsel %vm526_vm3, %v672_v28, -inf  ;;  %v687_v46 = vadd.f32 %v1620_v30, %v1392_v12  ;;  %v844_v28 = vunpack.c.0.s8 %v843_v26  ;;  %v846_v29 = vshrl.u32 %v845_v27, 7 }
 0x273   :  { %v681_v36 = vpop.f32.mrf.mxu0  ;;  %v731_v39 = vmax.f32 %v727_v35, %v730_v33 }
 0x274   :  { %v682_v48 = vadd.f32 %v1392_v12, %v681_v36  ;;  %v742_v55 = vsel %vm526_vm3, %v687_v46, -inf  ;;  %v847_v30 = vsub.s32 %v844_v28, %v846_v29  ;;  %v866_v33 = vsub.s32 0, %v846_v29 }
 0x275   :  { %v1623_v40 = vpop.f32.mrf.mxu0  ;;  %v734_v45 = vmax.f32 %v731_v39, %v733_v41 }
 0x276   :  { %v697_v43 = vadd.f32 %v1623_v40, %v1392_v12  ;;  %v741_v57 = vsel %vm526_vm3, %v682_v48, -inf }
 0x277   :  { %v691_v42 = vpop.f32.mrf.mxu0  ;;  %v735_v54 = vrot.slane %v734_v45, 4 }
 0x278   :  { %v692_v44 = vadd.f32 %v1392_v12, %v691_v42  ;;  %v745_v51 = vsel %vm526_vm3, %v697_v43, -inf }
 0x279   :  { %v1626_v47 = vpop.f32.mrf.mxu0  ;;  %v746_v61 = vmax.f32 %v742_v55, %v745_v51  ;;  %v736_v2 = vmax.f32 %v734_v45, %v735_v54  ;;  %v54_v51 = vld [vmem:[#allocation2 + $0xd8] sm:$0xff] }
 0x27a   :  { %v707_v49 = vadd.f32 %v1626_v47, %v1392_v12  ;;  %v743_v52 = vsel %vm526_vm3, %v692_v44, -inf }
 0x27b   :  { %v701_v50 = vpop.f32.mrf.mxu0  ;;  %v744_v62 = vmax.f32 %v741_v57, %v743_v52  ;;  %v737_v8 = vrot.slane %v736_v2, 2  ;;  %v53_v52 = vld [vmem:[#allocation2 + $0xd0] sm:$0xff] }
 0x27c   :  { %v702_v53 = vadd.f32 %v1392_v12, %v701_v50  ;;  %v749_v58 = vsel %vm526_vm3, %v707_v49, -inf  ;;  %v55_v50 = vld [vmem:[#allocation2 + $0xe0] sm:$0xff] }
 0x27d   :  { %v1629_v56 = vpop.f32.mrf.mxu0  ;;  %v750_v3 = vmax.f32 %v746_v61, %v749_v58  ;;  %v738_v11 = vmax.f32 %v736_v2, %v737_v8  ;;  %v1419_v2 = vld [vmem:[#allocation2 + $0x4] ss:$0 sm:$0xff] }
 0x27e   :  { %v747_v59 = vsel %vm526_vm3, %v702_v53, -inf  ;;  %v717_v60 = vadd.f32 %v1629_v56, %v1392_v12  ;;  %v1410_v53 = vld [vmem:[#allocation2 + $0x3] ss:$0 sm:$0xff]  ;;  %1109 = vrot.lane.b32.xlu1 %v1419_v2, %s1764_s0 }
 0x27f   :  { %v711_v63 = vpop.f32.mrf.mxu0  ;;  %v748_v4 = vmax.f32 %v744_v62, %v747_v59  ;;  %v739_v15 = vrot.slane %v738_v11, 1 }
 0x280   :  { %v753_v0 = vsel %vm526_vm3, %v717_v60, -inf  ;;  %v712_v1 = vadd.f32 %v1392_v12, %v711_v63 }
 0x281   :  { %v754_v6 = vmax.f32 %v750_v3, %v753_v0  ;;  %v740_v18 = vmax.f32 %v738_v11, %v739_v15  ;;  %v64_v15 = vld [vmem:[#allocation2 + $0x128] sm:$0xff] }
 0x282   :  { %v751_v5 = vsel %vm526_vm3, %v712_v1, -inf  ;;  %1691 = vmatprep.subr.mxu0 %v64_v15 }
 0x283   :  { %v752_v7 = vmax.f32 %v748_v4, %v751_v5  ;;  %1692 = vmatpush3.msra.mxu0 %v64_v15 }
 0x285   :  { %v755_v9 = vmax.f32 %v752_v7, %v754_v6  ;;  %v60_v6 = vld [vmem:[#allocation2 + $0x108] sm:$0xff]  ;;  %v59_v7 = vld [vmem:[#allocation2 + $0x100] sm:$0xff] }
 0x287   :  { %v756_v10 = vrot.slane %v755_v9, 4 }
 0x289   :  { %v757_v13 = vmax.f32 %v755_v9, %v756_v10  ;;  %v58_v9 = vld [vmem:[#allocation2 + $0xf8] sm:$0xff]  ;;  %v57_v10 = vld [vmem:[#allocation2 + $0xf0] sm:$0xff] }
 0x28b   :  { %v758_v14 = vrot.slane %v757_v13, 2 }
 0x28d   :  { %v759_v16 = vmax.f32 %v757_v13, %v758_v14 }
 0x28f   :  { %v760_v17 = vrot.slane %v759_v16, 1 }
 0x291   :  { %v761_v19 = vmax.f32 %v759_v16, %v760_v17  ;;  %v63_v16 = vld [vmem:[#allocation2 + $0x120] sm:$0xff] }
 0x292   :  { %1693 = vmatprep.subr.mxu0 %v63_v16 }
 0x293   :  { %v765_v12 = vsel %vm764_vm5, %v761_v19, %v740_v18  ;;  %1694 = vmatpush3.msra.mxu0 %v63_v16 }
 0x294   :  { %1647 = vmatmul.mubr.msk.f32.vlgmr.msra.gmra.mxu1 %vm526_vm3, %v765_v12  ;;  %768 = vst.msk [vmem:[#allocation5] sm:$0x3] %vm767_vm6, %v765_v12  ;;  %v62_v12 = vld [vmem:[#allocation2 + $0x118] sm:$0xff] }
 0x295   :  { %1650 = vmatpush3.msra.mxu1 %v52_v20  ;;  %1695 = vmatprep.subr.mxu0 %v62_v12 }
 0x296   :  { %1651 = vmatprep.subr.mxu1 %v51_v21  ;;  %1696 = vmatpush3.msra.mxu0 %v62_v12 }
 0x297   :  { %1652 = vmatpush3.msra.mxu1 %v51_v21 }
 0x298   :  { %1653 = vmatprep.subr.mxu1 %v50_v22 }
 0x299   :  { %1654 = vmatpush3.msra.mxu1 %v50_v22 }
 0x29a   :  { %1655 = vmatprep.subr.mxu1 %v49_v23 }
 0x29b   :  { %1656 = vmatpush3.msra.mxu1 %v49_v23  ;;  %v61_v23 = vld [vmem:[#allocation2 + $0x110] sm:$0xff] }
 0x29c   :  { %1663 = vmatprep.subr.mxu1 %v56_v24  ;;  %1697 = vmatprep.subr.mxu0 %v61_v23 }
 0x29d   :  { %1698 = vmatpush3.msra.mxu0 %v61_v23 }
 0x2f0   :  { %v1110_v11 = vpop.permute.xlu1 %1109 }
 0x354   :  { %v837_v31 = vpop.f32.mrf.mxu1 }
 0x355   :  { %v848_v32 = vrot.slane %v837_v31, %v847_v30 }
 0x356   :  { %v1648_v34 = vpop.f32.mrf.mxu1 }
 0x357   :  { %v849_v35 = vcombine.high %v848_v32, %v848_v32  ;;  %v856_v36 = vrot.slane %v848_v32, %v847_v30 }
 0x359   :  { %v863_v39 = vrot.slane %v849_v35, %v847_v30  ;;  %v1903_v40 = vrot.slane %v856_v36, %v866_v33  ;;  %v1420_v36 = vld [vmem:[#allocation2 + $0x5] ss:$0 sm:$0xff] }
 0x35b   :  { %v1905_v41 = vrot.slane %v863_v39, %v866_v33  ;;  %v874_v42 = vadd.f32 %v1903_v40, %v65_v37  ;;  %v875_v43 = vadd.f32 %v1903_v40, %v66_v38 }
 0x35d   :  { %v878_v44 = vmax.f32 %v874_v42, 0.0  ;;  %v879_v45 = vmax.f32 %v875_v43, 0.0  ;;  %v876_v46 = vadd.f32 %v1905_v41, %v65_v37  ;;  %v877_v47 = vadd.f32 %v1905_v41, %v66_v38 }
 0x35f   :  { %1657 = vmatprep.mubr.msk.f32.mxu1 %vm312_vm2, %v878_v44  ;;  %v880_v48 = vmax.f32 %v876_v46, 0.0  ;;  %v881_v49 = vmax.f32 %v877_v47, 0.0 }
 0x360   :  { %1658 = vmatmul.mubr.msk.f32.vlgmr.msra.gmra.mxu1 %vm312_vm2, %v879_v45 }
 0x361   :  { %1660 = vmatprep.mubr.msk.f32.mxu1 %vm312_vm2, %v880_v48  ;;  %1664 = vmatpush3.msra.mxu1 %v56_v24 }
 0x362   :  { %1665 = vmatprep.subr.mxu1 %v55_v50 }
 0x363   :  { %1666 = vmatpush3.msra.mxu1 %v55_v50 }
 0x364   :  { %1661 = vmatmul.mubr.msk.f32.gmra.mxu1 %vm312_vm2, %v881_v49  ;;  %1667 = vmatprep.subr.mxu1 %v54_v51 }
 0x365   :  { %1668 = vmatpush3.msra.mxu1 %v54_v51 }
 0x366   :  { %1669 = vmatprep.subr.mxu1 %v53_v52 }
 0x367   :  { %1670 = vmatpush3.msra.mxu1 %v53_v52 }
 0x368   :  { %1677 = vmatprep.subr.mxu1 %v60_v6 }
 0x420   :  { %v1659_v54 = vpop.f32.mrf.mxu1 }
 0x421   :  { %v970_v55 = vadd.f32 %v1659_v54, %v1410_v53 }
 0x422   :  { %v964_v56 = vpop.f32.mrf.mxu1 }
 0x423   :  { %v965_v57 = vadd.f32 %v1410_v53, %v964_v56  ;;  %v984_v60 = vmax.f32 %v970_v55, 0.0 }
 0x424   :  { %v1662_v58 = vpop.f32.mrf.mxu1 }
 0x425   :  { %v983_v59 = vmax.f32 %v965_v57, 0.0  ;;  %v980_v61 = vadd.f32 %v1662_v58, %v1410_v53 }
 0x426   :  { %v974_v62 = vpop.f32.mrf.mxu1 }
 0x427   :  { %v975_v63 = vadd.f32 %v1410_v53, %v974_v62  ;;  %1671 = vmatprep.mubr.msk.f32.mxu1 %vm312_vm2, %v983_v59  ;;  %v986_v1 = vmax.f32 %v980_v61, 0.0 }
 0x428   :  { %1672 = vmatmul.mubr.msk.f32.vlgmr.msra.gmra.mxu1 %vm312_vm2, %v984_v60 }
 0x429   :  { %v985_v0 = vmax.f32 %v975_v63, 0.0  ;;  %1678 = vmatpush3.msra.mxu1 %v60_v6 }
 0x42a   :  { %1679 = vmatprep.subr.mxu1 %v59_v7 }
 0x42b   :  { %1674 = vmatprep.mubr.msk.f32.mxu1 %vm312_vm2, %v985_v0  ;;  %1680 = vmatpush3.msra.mxu1 %v59_v7 }
 0x42c   :  { %1675 = vmatmul.mubr.msk.f32.gmra.mxu1 %vm312_vm2, %v986_v1  ;;  %1681 = vmatprep.subr.mxu1 %v58_v9 }
 0x42d   :  { %1682 = vmatpush3.msra.mxu1 %v58_v9 }
 0x42e   :  { %1683 = vmatprep.subr.mxu1 %v57_v10 }
 0x42f   :  { %1684 = vmatpush3.msra.mxu1 %v57_v10 }
 0x4e8   :  { %v1673_v3 = vpop.f32.mrf.mxu1 }
 0x4ea   :  { %v1065_v4 = vpop.f32.mrf.mxu1 }
 0x4eb   :  { %1088 = vrot.lane.b32.xlu0 %v1065_v4, %s1764_s0 }
 0x4ec   :  { %v1676_v5 = vpop.f32.mrf.mxu1 }
 0x4ee   :  { %v1075_v8 = vpop.f32.mrf.mxu1 }
 0x4ef   :  { %1090 = vrot.lane.b32.xlu0 %v1673_v3, %s1764_s0  ;;  %1092 = vrot.lane.b32.xlu1 %v1075_v8, %s1764_s0 }
 0x4f3   :  { %1094 = vrot.lane.b32.xlu0 %v1676_v5, %s1764_s0 }
 0x55d   :  { %v1089_v13 = vpop.permute.xlu0 %1088 }
 0x55e   :  { %v1100_v14 = vadd.f32 %v1089_v13, %v1903_v40 }
 0x560   :  { %v1112_v17 = vadd.f32 %v1110_v11, %v1100_v14 }
 0x561   :  { %v1091_v18 = vpop.permute.xlu0 %1090  ;;  %v1093_v19 = vpop.permute.xlu1 %1092 }
 0x562   :  { %v1116_v20 = vmax.f32 %v1112_v17, 0.0  ;;  %v1101_v21 = vadd.f32 %v1091_v18, %v1903_v40  ;;  %v1102_v22 = vadd.f32 %v1093_v19, %v1905_v41 }
 0x564   :  { %v1113_v24 = vadd.f32 %v1110_v11, %v1101_v21  ;;  %v1114_v25 = vadd.f32 %v1110_v11, %v1102_v22  ;;  %1128 = vrot.lane.b32.xlu1 %v1116_v20, %s1765_s23 }
 0x565   :  { %v1095_v26 = vpop.permute.xlu0 %1094 }
 0x566   :  { %v1117_v27 = vmax.f32 %v1113_v24, 0.0  ;;  %v1118_v28 = vmax.f32 %v1114_v25, 0.0  ;;  %v1103_v29 = vadd.f32 %v1095_v26, %v1905_v41 }
 0x568   :  { %v1115_v30 = vadd.f32 %v1110_v11, %v1103_v29  ;;  %1130 = vrot.lane.b32.xlu0 %v1117_v27, %s1765_s23  ;;  %1132 = vrot.lane.b32.xlu1 %v1118_v28, %s1765_s23 }
 0x56a   :  { %v1119_v31 = vmax.f32 %v1115_v30, 0.0 }
 0x56c   :  { %1134 = vrot.lane.b32.xlu0 %v1119_v31, %s1765_s23 }
 0x5d6   :  { %v1129_v32 = vpop.permute.xlu1 %1128 }
 0x5d7   :  { %1685 = vmatprep.mubr.msk.f32.mxu1 %vm312_vm2, %v1129_v32 }
 0x5da   :  { %v1131_v33 = vpop.permute.xlu0 %1130  ;;  %v1133_v34 = vpop.permute.xlu1 %1132 }
 0x5db   :  { %1686 = vmatmul.mubr.msk.f32.vlgmr.msra.gmra.mxu1 %vm312_vm2, %v1131_v33 }
 0x5dc   :  { %1688 = vmatprep.mubr.msk.f32.mxu1 %vm312_vm2, %v1133_v34 }
 0x5de   :  { %v1135_v35 = vpop.permute.xlu0 %1134 }
 0x5df   :  { %1689 = vmatmul.mubr.msk.f32.gmra.mxu1 %vm312_vm2, %v1135_v35 }
 0x69b   :  { %v1687_v37 = vpop.f32.mrf.mxu1 }
 0x69c   :  { %v1216_v38 = vadd.f32 %v1687_v37, %v1420_v36 }
 0x69d   :  { %v1210_v39 = vpop.f32.mrf.mxu1 }
 0x69e   :  { %v1211_v40 = vadd.f32 %v1420_v36, %v1210_v39  ;;  %v1230_v43 = vmax.f32 %v1216_v38, 0.0 }
 0x69f   :  { %v1690_v41 = vpop.f32.mrf.mxu1 }
 0x6a0   :  { %v1229_v42 = vmax.f32 %v1211_v40, 0.0  ;;  %v1226_v44 = vadd.f32 %v1690_v41, %v1420_v36 }
 0x6a1   :  { %v1220_v45 = vpop.f32.mrf.mxu1 }
 0x6a2   :  { %v1221_v46 = vadd.f32 %v1420_v36, %v1220_v45  ;;  %1699 = vmatprep.mubr.msk.f32.mxu0 %vm312_vm2, %v1229_v42  ;;  %v1232_v48 = vmax.f32 %v1226_v44, 0.0 }
 0x6a3   :  { %1700 = vmatmul.mubr.msk.f32.vlgmr.msra.gmra.mxu0 %vm312_vm2, %v1230_v43 }
 0x6a4   :  { %v1231_v47 = vmax.f32 %v1221_v46, 0.0 }
 0x6a6   :  { %1702 = vmatprep.mubr.msk.f32.mxu0 %vm312_vm2, %v1231_v47 }
 0x6a7   :  { %1703 = vmatmul.mubr.msk.f32.gmra.mxu0 %vm312_vm2, %v1232_v48 }
 0x6a8   :  { %1745 = shalt.err (!%p1742_p9)
}
 0x6a9   :  { %1349 = dma.vmem_to_hbm [thread:$0]  %s1347_s1, 32, %s1953_s3, [#allocation4]   ;;  %v1425_v49 = vld [vmem:[#allocation2 + $0x6] ss:$0 sm:$0xff] }
 0x763   :  { %v1701_v50 = vpop.f32.mrf.mxu0 }
 0x764   :  { %v1321_v51 = vadd.f32 %v1701_v50, %v1425_v49 }
 0x765   :  { %v1315_v52 = vpop.f32.mrf.mxu0 }
 0x766   :  { %1335 = vst.msk [vmem:[%s1952_s2 + $0x8] sm:$0xff] %vm94_vm1, %v1321_v51  ;;  %v1316_v53 = vadd.f32 %v1425_v49, %v1315_v52 }
 0x767   :  { %v1704_v54 = vpop.f32.mrf.mxu0 }
 0x768   :  { %1334 = vst.msk [vmem:[%s1952_s2] sm:$0xff] %vm94_vm1, %v1316_v53  ;;  %v1331_v55 = vadd.f32 %v1704_v54, %v1425_v49 }
 0x769   :  { %v1325_v56 = vpop.f32.mrf.mxu0 }
 0x76a   :  { %1337 = vst.msk [vmem:[%s1952_s2 + $0x18] sm:$0xff] %vm94_vm1, %v1331_v55  ;;  %v1326_v57 = vadd.f32 %v1425_v49, %v1325_v56 }
 0x76c   :  { %1336 = vst.msk [vmem:[%s1952_s2 + $0x10] sm:$0xff] %vm94_vm1, %v1326_v57 }
 0x76d   :  { %1756 = dma.done.wait [#allocation4], 32  }
 0x76e   :  { %1757 = vsyncadd [#allocation4], 4294967264 }
 0x76f   :  { %1355 = vsyncpa [#allocation3], 1 }
 0x770   :  { %1356 = vsyncpa [#allocation4], 1 }

</bundles_post_ra>
